<compile_context>
chip_gen: v7x
topology: tpu7x:2x2x1
jax: 0.10.0
libtpu: 0.0.40
codegen_flags: <defaults>
</compile_context>

<pallas_src>
import functools

import jax
import jax.numpy as jnp
from jax.experimental import pallas as pl
from jax.experimental.pallas import tpu as pltpu


def _linear_kernel(x_ref, w_ref, p_ref, o_ref, *, apply_relu_bn):
    """One N-tile of y = bn(relu(x @ W + b)) (or plain x @ W + b).

    Full K is resident, so there is no reduction axis / accumulator: a single
    bf16 MXU dot with f32 accumulation, f32 epilogue, one lane-dense store.
    p_ref is (3, tn): row 0 = bias, row 1 = bn scale, row 2 = bn shift.
    """
    x = x_ref[...].astype(jnp.bfloat16)
    y = jnp.dot(x, w_ref[...], preferred_element_type=jnp.float32)
    y = y + p_ref[0:1, :]
    if apply_relu_bn:
        y = jnp.maximum(y, 0.0) * p_ref[1:2, :] + p_ref[2:3, :]
    o_ref[...] = y.astype(o_ref.dtype)


def linear_layer(x, w_bf16, params, *, apply_relu_bn=True, tn=None):
    """x: (B, K) f32, w_bf16: (K, N) bf16, params: (3, N) f32. Returns (B, N) f32."""
    B, K = x.shape
    Kw, N = w_bf16.shape
    assert K == Kw
    assert params.shape == (3, N)

    if tn is None:
        # Keep >=2 parallel N blocks so both v7x TensorCores stream weights.
        tn = N // 2 if N >= 256 else N
    assert N % tn == 0 and tn % 128 == 0, (N, tn)

    kernel = functools.partial(_linear_kernel, apply_relu_bn=apply_relu_bn)

    return pl.pallas_call(
        kernel,
        out_shape=jax.ShapeDtypeStruct((B, N), jnp.float32),
        grid_spec=pltpu.PrefetchScalarGridSpec(
            num_scalar_prefetch=0,
            grid=(N // tn,),
            in_specs=[
                pl.BlockSpec((B, K), lambda j: (0, 0)),    # x (resident, full K)
                pl.BlockSpec((K, tn), lambda j: (0, j)),   # weights (bf16 stream)
                pl.BlockSpec((3, tn), lambda j: (0, j)),   # packed bias/scale/shift
            ],
            out_specs=pl.BlockSpec((B, tn), lambda j: (0, j)),
        ),
        compiler_params=pltpu.CompilerParams(
            dimension_semantics=("parallel",),
            vmem_limit_bytes=64 << 20,
        ),
    )(x, w_bf16, params)


def init_linear(key, fan_in, fan_out):
    """PyTorch nn.Linear default init: U(-1/sqrt(fan_in), 1/sqrt(fan_in))."""
    kw, kb = jax.random.split(key)
    bound = 1.0 / jnp.sqrt(float(fan_in))
    w = jax.random.uniform(kw, (fan_in, fan_out), jnp.float32, -bound, bound)
    b = jax.random.uniform(kb, (fan_out,), jnp.float32, -bound, bound)
    return w, b


def init_batchnorm(num_features, eps=1e-5):
    """PyTorch BatchNorm1d init (eval): gamma=1, beta=0, mean=0, var=1."""
    gamma = jnp.ones((num_features,), jnp.float32)
    beta = jnp.zeros((num_features,), jnp.float32)
    running_mean = jnp.zeros((num_features,), jnp.float32)
    running_var = jnp.ones((num_features,), jnp.float32)
    scale = gamma / jnp.sqrt(running_var + eps)
    shift = beta - running_mean * scale
    return scale, shift


def build_params(key):
    dims = [(768, 768), (768, 768), (768, 768), (768, 1536),
            (1536, 1536), (1536, 1536), (1536, 1536), (1536, 1)]
    keys = jax.random.split(key, len(dims))

    hidden = []
    for k, (fi, fo) in zip(keys[:-1], dims[:-1]):
        w, b = init_linear(k, fi, fo)
        scale, shift = init_batchnorm(fo)
        hidden.append((w.astype(jnp.bfloat16),
                       jnp.stack([b, scale, shift], axis=0)))  # (3, fo) f32

    # Output layer: pad N=1 -> 128 once at build time (lane-aligned output tile).
    fi, fo = dims[-1]
    w, b = init_linear(keys[-1], fi, fo)
    pad_n = 128
    w_pad = (jnp.zeros((fi, pad_n), jnp.float32).at[:, :fo].set(w)
             ).astype(jnp.bfloat16)
    p_pad = jnp.zeros((3, pad_n), jnp.float32).at[0, :fo].set(b)
    out_layer = (w_pad, p_pad, fo)
    return hidden, out_layer


def binary_classification_forward(x, hidden, out_layer):
    """Forward pass of BinaryClassification (eval mode)."""
    h = x
    for w, p in hidden:
        h = linear_layer(h, w, p, apply_relu_bn=True)
        # dropout(p=0.2) after layers 4 and 7 is identity in eval mode.
    w_pad, p_pad, n_out = out_layer
    out = linear_layer(h, w_pad, p_pad, apply_relu_bn=False, tn=128)
    return out[:, :n_out]


def reference_forward(x, hidden, out_layer):
    """Pure-JAX reference matching the kernel's bf16-weight / f32-accum math."""
    h = x
    for w, p in hidden:
        y = jnp.dot(h.astype(jnp.bfloat16), w, preferred_element_type=jnp.float32)
        y = y + p[0:1, :]
        h = jnp.maximum(y, 0.0) * p[1:2, :] + p[2:3, :]
    w_pad, p_pad, n_out = out_layer
    y = jnp.dot(h.astype(jnp.bfloat16), w_pad, preferred_element_type=jnp.float32)
    y = y + p_pad[0:1, :]
    return y[:, :n_out]


if __name__ == "__main__":
    key = jax.random.PRNGKey(0)
    k_params, k_input = jax.random.split(key)

    hidden, out_layer = build_params(k_params)

    batch = 8
    x = jax.random.normal(k_input, (batch, 768), jnp.float32)

    out = binary_classification_forward(x, hidden, out_layer)
    out = jax.block_until_ready(out)

    ref = reference_forward(x, hidden, out_layer)
    assert out.shape == (batch, 1), out.shape
    assert jnp.allclose(out, ref, atol=2e-2, rtol=2e-2), (
        float(jnp.max(jnp.abs(out - ref))))

    print("KERNEL_OK")
</pallas_src>

<mosaic_0001>
module attributes {stable_mosaic.version = 11 : i64} {
  func.func @_linear_kernel(%arg0: i32, %arg1: memref<8x768xf32, #tpu.memory_space<vmem>>, %arg2: memref<768x384xbf16, #tpu.memory_space<vmem>>, %arg3: memref<3x384xf32, #tpu.memory_space<vmem>>, %arg4: memref<8x384xf32, #tpu.memory_space<vmem>>) attributes {dimension_semantics = [#tpu.dimension_semantics<parallel>], iteration_bounds = array<i64: 2>, scalar_prefetch = 0 : i64, scratch_operands = 0 : i64, tpu.core_type = #tpu.core_type<tc>, window_params = [{pipeline_mode = #tpu.pipeline_mode<synchronous>, transform_indices = @transform_0, window_bounds = array<i64: 8, 768>}, {transform_indices = @transform_1, window_bounds = array<i64: 768, 384>}, {transform_indices = @transform_2, window_bounds = array<i64: 3, 384>}, {transform_indices = @transform_3, window_bounds = array<i64: 8, 384>}]} {
    %c0 = arith.constant 0 : index
    %c0_0 = arith.constant 0 : index
    %0 = vector.load %arg1[%c0, %c0_0] : memref<8x768xf32, #tpu.memory_space<vmem>>, vector<8x768xf32>
    %1 = arith.truncf %0 : vector<8x768xf32> to vector<8x768xbf16>
    %c0_1 = arith.constant 0 : index
    %c0_2 = arith.constant 0 : index
    %2 = vector.load %arg2[%c0_1, %c0_2] : memref<768x384xbf16, #tpu.memory_space<vmem>>, vector<768x384xbf16>
    %cst = arith.constant dense<0.000000e+00> : vector<8x384xf32>
    %3 = tpu.matmul %1, %2, %cst {dimension_numbers = #tpu.dot_dimension_numbers<[1], [0], [0], [1], [0, 0, 1, 1], [], []>} : vector<8x768xbf16>, vector<768x384xbf16>, vector<8x384xf32> -> vector<8x384xf32>
    %c0_3 = arith.constant 0 : index
    %c0_4 = arith.constant 0 : index
    %4 = vector.load %arg3[%c0_3, %c0_4] : memref<3x384xf32, #tpu.memory_space<vmem>>, vector<1x384xf32>
    %5 = vector.broadcast %4 : vector<1x384xf32> to vector<8x384xf32>
    %6 = arith.addf %3, %5 : vector<8x384xf32>
    %cst_5 = arith.constant 0.000000e+00 : f32
    %7 = vector.broadcast %cst_5 : f32 to vector<8x384xf32>
    %8 = arith.maximumf %6, %7 : vector<8x384xf32>
    %c1 = arith.constant 1 : index
    %c0_6 = arith.constant 0 : index
    %9 = vector.load %arg3[%c1, %c0_6] : memref<3x384xf32, #tpu.memory_space<vmem>>, vector<1x384xf32>
    %10 = vector.broadcast %9 : vector<1x384xf32> to vector<8x384xf32>
    %11 = arith.mulf %8, %10 : vector<8x384xf32>
    %c2 = arith.constant 2 : index
    %c0_7 = arith.constant 0 : index
    %12 = vector.load %arg3[%c2, %c0_7] : memref<3x384xf32, #tpu.memory_space<vmem>>, vector<1x384xf32>
    %13 = vector.broadcast %12 : vector<1x384xf32> to vector<8x384xf32>
    %14 = arith.addf %11, %13 : vector<8x384xf32>
    %c0_8 = arith.constant 0 : index
    %c0_9 = arith.constant 0 : index
    %15 = vector.load %arg4[%c0_8, %c0_9] : memref<8x384xf32, #tpu.memory_space<vmem>>, vector<8x384xf32>
    tpu.vector_store %arg4[%c0_8, %c0_9], %14 {strides = array<i32>} : memref<8x384xf32, #tpu.memory_space<vmem>>, vector<8x384xf32>,
    return
  }
  func.func @transform_0(%arg0: i32) -> (i32, i32) {
    %c0_i32 = arith.constant 0 : i32
    %c0_i32_0 = arith.constant 0 : i32
    %c0_i32_1 = arith.constant 0 : i32
    return %c0_i32, %c0_i32_0 : i32, i32
  }
  func.func @transform_1(%arg0: i32) -> (i32, i32) {
    %c0_i32 = arith.constant 0 : i32
    %c0_i32_0 = arith.constant 0 : i32
    return %c0_i32, %arg0 : i32, i32
  }
  func.func @transform_2(%arg0: i32) -> (i32, i32) {
    %c0_i32 = arith.constant 0 : i32
    %c0_i32_0 = arith.constant 0 : i32
    return %c0_i32, %arg0 : i32, i32
  }
  func.func @transform_3(%arg0: i32) -> (i32, i32) {
    %c0_i32 = arith.constant 0 : i32
    %c0_i32_0 = arith.constant 0 : i32
    return %c0_i32, %arg0 : i32, i32
  }
}

</mosaic_0001>

<bundles_post_ra>
// kernel: tpu_custom_call.1
= control target key start
LH: loop header
LB: loop body
LE: loop exit
PB: predicated region body
PF: predicated region fallthrough
CT: control target
= control target key end

     0   :  { %8 = vsyncpa [#allocation3], 0  ;;  %s2725_s0 = inlined_call_operand.hbm [shape: f32[8,768], index: 0, kind: input, shape index: {}]   ;;  %s2726_s1 = inlined_call_operand.hbm [shape: bf16[768,768], index: 1, kind: input, shape index: {}]   ;;  %s2727_s2 = inlined_call_operand.hbm [shape: f32[3,768], index: 2, kind: input, shape index: {}]   ;;  %s2728_s3 = inlined_call_operand.hbm [shape: f32[8,768], index: 3, kind: output, shape index: {}]  }
   0x1   :  { %9 = vsyncpa [#allocation6], 0 }
   0x2   :  { %11 = vsyncpa [#allocation6 + $0x1], 0 }
   0x3   :  { %12 = vsyncpa [#allocation4], 0 }
   0x4   :  { %14 = vsyncpa [#allocation4 + $0x1], 0  ;;  %s2321_s12 = smov 0   ;;  %s2323_s13 = smov 0  }
   0x5   :  { %s2325_s14 = smov 0   ;;  %s2327_s15 = smov 0  }
   0x6 LB: > { %s2342_s16 = sadd.s32 1, %s2292_s15   ;;  %s48_s17 = sadd.s32 1, %s2288_s14  ;;  %s2292_s15 = sphi %s2327_s15, %s2755_s15   ;;  %s2288_s14 = sphi %s2325_s14, %s2754_s14   ;;  %s2284_s13 = sphi %s2323_s13, %s2753_s13   ;;  %s2280_s12 = sphi %s2321_s12, %s2752_s12  }
   0x7   : > { %s45_s18 = ssub.s32 %s2292_s15, %s2342_s16  ;;  %p55_p0 = scmp.ne.s32.totalorder %s2288_s14, %s2284_s13 }
   0x8   : > { %p46_p1 = scmp.eq.s32.totalorder %s45_s18, 0  ;;  %p56_p2 = scmp.eq.s32.totalorder %s2292_s15, 0 }
   0x9   : > { %p1903_p4 = scmp.lt.s32.totalorder %s2292_s15, 2  ;;  %s148_s20 = sand.u32 1, %s2292_s15  }
   0xa   : > { %s2353_s19 = scalar_select %p46_p1, %s2288_s14, %s48_s17  }
   0xb   : > { %p57_p5 = por %p56_p2, %p55_p0  ;;  %s150_s21 = sand.u32 1, %s2288_s14  }
   0xc   : > { %s1872_s22 = smul.u32 1152, %s150_s21  ;;  %s2376_s30 = scalar_lea.sflag [#allocation6], %s148_s20 }
   0xd   : > { %p2362_p6 = pnand %p1903_p4, %p57_p5  ;;  %s1795_s24 = smul.u32 192, %s2292_s15 }
   0xe   : > { %s152_s28 = scalar_lea.vmem [#allocation5], %s1872_s22  ;;  %s2139_s7 = scalar_lea.hbm %s2726_s1, 36864 }
   0xf   : > { %s2736_s23 = scalar_select %p2362_p6, 1, 0 }
  0x10   : > { %s2372_s27 = scalar_lea.hbm %s2726_s1, %s1795_s24  ;;  %s159_s29 = sshll.u32 %s152_s28, 4  ;;  %s2374_s29 = int_to_ptr.vmem [resolvable:$true] %s159_s29 }
  0x11   : > { %s2134_s4 = scalar_lea.hbm %s2372_s27, 18432  ;;  %p2730_p8 = pneg %p2362_p6 }
  0x12   : > { %p2135_p7 = scmp.ne.s32.totalorder %s2372_s27, %s2134_s4  ;;  %p2140_p11 = scmp.lt.u32.totalorder %s2372_s27, %s2726_s1 }
  0x13   : > { %p2141_p12 = scmp.lt.u32.totalorder %s2139_s7, %s2134_s4  ;;  %p2143_p1 = scmp.lt.u32.totalorder %s2134_s4, %s2372_s27 }
  0x14   : > { %p2137_p9 = pnand %p2730_p8, %p2135_p7 }
  0x15   : > { %p2142_p13 = por %p2141_p12, %p2140_p11 }
  0x16   : > { %p2138_p10 = pneg %p2137_p9 }
  0x17   : > { %p2144_p2 = por %p2143_p1, %p2142_p13 }
  0x19   : > { %p2145_p4 = pnand %p2144_p2, %p2138_p10 }
  0x1b   : > { %2148 = shalt.err (!%p2145_p4)
}
  0x1c   : > { %s2149_s10 = scalar_lea.vmem %s2374_s29, 18432  ;;  %s2294_s11 = smov [#allocation5]  }
  0x1d   : > { %p2150_p5 = scmp.ne.s32.totalorder %s2374_s29, %s2149_s10  ;;  %s2154_s17 = sshll.u32 %s2294_s11, 4  ;;  %s2155_s17 = int_to_ptr.vmem [resolvable:$false] %s2154_s17 }
  0x1e   : > { %s2156_s18 = scalar_lea.vmem %s2155_s17, 36864  ;;  %p2157_p3 = scmp.lt.s32.totalorder %s2374_s29, %s2155_s17 }
  0x1f   : > { %p2152_p7 = pnand %p2150_p5, %p2730_p8  ;;  %p2158_p11 = scmp.lt.s32.totalorder %s2156_s18, %s2149_s10 }
  0x21   : > { %p2153_p9 = pneg %p2152_p7  ;;  %p2159_p12 = por %p2158_p11, %p2157_p3 }
  0x23   : > { %p2160_p13 = pnand %p2159_p12, %p2153_p9 }
  0x25   : > { %2163 = shalt.err (!%p2160_p13)
}
  0x26   : > { %s2295_s20 = smov 384   ;;  %s2296_s22 = smov 192  }
  0x27   : > { %s2297_s25 = smov 12   ;;  %s2405_s26 = sadd.s32 4294967295, %s2292_s15  }
  0x28   : > { %1894 = dma.hbm_to_vmem [thread:$0]  (!%p2362_p6), %s2372_s27, 18432, %s2374_s29, %s2376_s30, %s2295_s20, %s2296_s22, %s2297_s25  }
  0x29   : > { %s1638_s28 = sadd.s32 4294967294, %s2292_s15   ;;  %p61_p3 = scmp.ne.s32.totalorder %s2284_s13, %s2280_s12 }
  0x2a   : > { %p2729_p10 = scmp.eq.s32.totalorder %s2405_s26, 0  ;;  %p111_p1 = scmp.eq.s32.totalorder %s2405_s26, 1 }
  0x2b   : > { %p117_p2 = scmp.eq.s32.totalorder %s1638_s28, 1  ;;  %p1639_p4 = scmp.ge.s32.totalorder %s2292_s15, 1 }
  0x2c   : > { %p2415_p5 = por %p2729_p10, %p61_p3  ;;  %p2422_p7 = por %p111_p1, %p55_p0 }
  0x2d   : > { %p2426_p9 = por %p117_p2, %p61_p3  ;;  %p124_p11 = scmp.lt.s32.totalorder %s2292_s15, 3 }
  0x2e   : > { %s2737_s4 = scalar_select %p2415_p5, 1, 0 }
  0x2f   : > { %s2738_s27 = scalar_select %p2422_p7, 1, 0 }
  0x30   : > { %s2739_s29 = scalar_select %p2426_p9, 1, 0 }
  0x31   : > { %p2431_p12 = pnand %p1639_p4, %p124_p11  ;;  %s2298_s6 = smov [#allocation2]  }
  0x32   : > { %s137_s7 = sshll.u32 %s2298_s6, 4  ;;  %s1873_s8 = smul.u32 12, %s150_s21  ;;  %s138_s7 = int_to_ptr.vmem [resolvable:$true] %s137_s7 }
  0x33   : > { %s2740_s5 = scalar_select %p2431_p12, 1, 0 }
  0x34   : > { %p1887_p13 = pneg %p2431_p12  ;;  %s173_s10 = scalar_lea.vmem [#allocation7], %s1873_s8 }
  0x35   : > { %s181_s11 = sshll.u32 %s173_s10, 4  ;;  %s2450_s20 = scalar_lea.hbm %s2727_s2, %s1795_s24  ;;  %s2452_s11 = int_to_ptr.vmem [resolvable:$true] %s181_s11 }
  0x36   : > { %p2441_p0 = pnand %p1887_p13, %p2729_p10  ;;  %s2164_s25 = scalar_lea.hbm %s2725_s0, 768 }
  0x37   : > { %p2165_p3 = scmp.ne.s32.totalorder %s2725_s0, %s2164_s25  ;;  %p2171_p11 = scmp.lt.u32.totalorder %s2164_s25, %s2725_s0 }
  0x38   : > { %p2166_p1 = pneg %p2441_p0 }
  0x3a   : > { %p2167_p2 = pnand %p2166_p1, %p2165_p3 }
  0x3c   : > { %p2168_p4 = pneg %p2167_p2 }
  0x3e   : > { %p2173_p13 = pnand %p2171_p11, %p2168_p4 }
  0x40   : > { %2176 = shalt.err (!%p2173_p13)
}
  0x41   : > { %s2177_s24 = scalar_lea.vmem %s138_s7, 768  ;;  %p2185_p7 = scmp.lt.s32.totalorder %s138_s7, %s138_s7 }
  0x42   : > { %p2178_p10 = scmp.ne.s32.totalorder %s138_s7, %s2177_s24  ;;  %p2186_p5 = scmp.lt.s32.totalorder %s2177_s24, %s2177_s24 }
  0x44   : > { %p2180_p8 = pnand %p2178_p10, %p2166_p1  ;;  %p2187_p12 = por %p2186_p5, %p2185_p7 }
  0x46   : > { %p2181_p9 = pneg %p2180_p8 }
  0x48   : > { %p2188_p6 = pnand %p2187_p12, %p2181_p9 }
  0x4a   : > { %2191 = shalt.err (!%p2188_p6)
}
  0x4b   : > { %1890 = dma.hbm_to_vmem [thread:$0]  (!%p2441_p0), %s2725_s0, 768, %s138_s7, [#allocation3]  }
  0x4c   : > { %s2192_s21 = scalar_lea.hbm %s2450_s20, 192  ;;  %p2742_p10 = scmp.ne.s32.totalorder %s2736_s23, 0 }
  0x4d   : > { %p2193_p3 = scmp.ne.s32.totalorder %s2450_s20, %s2192_s21  ;;  %s2197_s28 = scalar_lea.hbm %s2727_s2, 384 }
  0x4e   : > { %p2743_p8 = pneg %p2742_p10  ;;  %p2198_p6 = scmp.lt.u32.totalorder %s2450_s20, %s2727_s2 }
  0x4f   : > { %p2199_p5 = scmp.lt.u32.totalorder %s2197_s28, %s2192_s21  ;;  %p2201_p9 = scmp.lt.u32.totalorder %s2192_s21, %s2450_s20 }
  0x50   : > { %p2195_p1 = pnand %p2193_p3, %p2743_p8 }
  0x51   : > { %p2200_p7 = por %p2199_p5, %p2198_p6 }
  0x52   : > { %p2196_p2 = pneg %p2195_p1 }
  0x53   : > { %p2202_p12 = por %p2201_p9, %p2200_p7 }
  0x55   : > { %p2203_p4 = pnand %p2202_p12, %p2196_p2 }
  0x57   : > { %2206 = shalt.err (!%p2203_p4)
}
  0x58   : > { %s2207_s7 = scalar_lea.vmem %s2452_s11, 192  ;;  %p2744_p11 = pmov %p2743_p8 }
  0x59   : > { %p2208_p0 = scmp.ne.s32.totalorder %s2452_s11, %s2207_s7  ;;  %s2299_s8 = smov [#allocation7]  }
  0x5a   : > { %s2212_s10 = sshll.u32 %s2299_s8, 4  ;;  %s2213_s10 = int_to_ptr.vmem [resolvable:$false] %s2212_s10 }
  0x5b   : > { %p2210_p13 = pnand %p2208_p0, %p2744_p11  ;;  %s2214_s24 = scalar_lea.vmem %s2213_s10, 384 }
  0x5c   : > { %p2215_p8 = scmp.lt.s32.totalorder %s2452_s11, %s2213_s10  ;;  %p2216_p1 = scmp.lt.s32.totalorder %s2214_s24, %s2207_s7 }
  0x5d   : > { %p2211_p3 = pneg %p2210_p13 }
  0x5e   : > { %p2217_p6 = por %p2216_p1, %p2215_p8 }
  0x60   : > { %p2218_p5 = pnand %p2217_p6, %p2211_p3 }
  0x62   : > { %2221 = shalt.err (!%p2218_p5)
}
  0x63   : > { %1897 = dma.hbm_to_vmem [thread:$0]  (!%p2742_p10), %s2450_s20, 192, %s2452_s11, %s2376_s30  }
  0x64   : > { %p2745_p2 = scmp.ne.s32.totalorder %s2740_s5, 0 }
  0x65   : > { %p2746_p7 = scmp.eq.s32.totalorder (!%p2745_p2), %s2405_s26, 0 }
  0x66   : > { %190 = sbr.rel (%p2745_p2) target bundleno = 513 (0x201), region = 32 }
  0x6d   : > { %2267 = dma.done.wait (%p2746_p7), [#allocation3], 768   ;;  %p2747_p9 = pmov %p2746_p7 }
  0x6e   : > { %s196_s17 = sand.u32 1, %s2405_s26   ;;  %s2502_s18 = sand.u32 1, %s2284_s13  }
  0x6f   : > { %2269 = vsyncadd (%p2747_p9), [#allocation3], 4294966528  ;;  %s1874_s23 = smul.u32 1152, %s2502_s18  ;;  %s197_s21 = scalar_lea.sflag [#allocation6], %s196_s17 }
  0x70   : > { %p2748_p10 = scmp.ne.s32.totalorder %s2737_s4, 0 }
  0x71   : > { %s2505_s22 = scalar_lea.vmem [#allocation5], %s1874_s23 }
  0x72   : > { %2271 = dma.done.wait (%p2748_p10), %s197_s21, 18624  }
  0x73   : > { %2273 = vsyncadd (%p2748_p10), %s197_s21, 4294948672  ;;  %v1942_v0 = vld [vmem:[%s2505_s22 + $0x4] ss:$12 sps:$4 sm:$0xff]   ;;  %v1946_v2 = vld [vmem:[%s2505_s22] ss:$12 sps:$4 sm:$0xff]   ;;  %s1875_s30 = smul.u32 12, %s2502_s18 }
  0x74   : > { %v1944_v1 = vld [vmem:[%s2505_s22 + $0x184] ss:$12 sps:$4 sm:$0xff]   ;;  %1230 = vmatprep.subr.bf16.mxu1 %v1942_v0  ;;  %v1947_v3 = vld [vmem:[%s2505_s22 + $0x180] ss:$12 sps:$4 sm:$0xff]   ;;  %v1948_v4 = vld [vmem:[%s2505_s22 + $0x1c] ss:$12 sps:$4 sm:$0xff]  }
  0x75   : > { %1271 = vmatprep.subr.bf16.mxu0 %v1944_v1  ;;  %1231 = vmatpush1.bf16.msra.mxu1 %v1946_v2  ;;  %v1950_v5 = vld [vmem:[%s2505_s22 + $0x19c] ss:$12 sps:$4 sm:$0xff]   ;;  %v1952_v6 = vld [vmem:[%s2505_s22 + $0x18] ss:$12 sps:$4 sm:$0xff]   ;;  %v1954_v8 = vld [vmem:[%s2505_s22 + $0x34] ss:$12 sps:$4 sm:$0xff]  }
  0x76   : > { %1272 = vmatpush1.bf16.msra.mxu0 %v1947_v3  ;;  %1232 = vmatprep.subr.bf16.mxu1 %v1948_v4  ;;  %v1953_v7 = vld [vmem:[%s2505_s22 + $0x198] ss:$12 sps:$4 sm:$0xff]   ;;  %v1956_v9 = vld [vmem:[%s2505_s22 + $0x1b4] ss:$12 sps:$4 sm:$0xff]   ;;  %v1958_v10 = vld [vmem:[%s2505_s22 + $0x30] ss:$12 sps:$4 sm:$0xff]  }
  0x77   : > { %1273 = vmatprep.subr.bf16.mxu0 %v1950_v5  ;;  %v1959_v11 = vld [vmem:[%s2505_s22 + $0x1b0] ss:$12 sps:$4 sm:$0xff]   ;;  %v1960_v12 = vld [vmem:[%s2505_s22 + $0x4c] ss:$12 sps:$4 sm:$0xff]   ;;  %v1964_v14 = vld [vmem:[%s2505_s22 + $0x48] ss:$12 sps:$4 sm:$0xff]  }
  0x78   : > { %v1962_v13 = vld [vmem:[%s2505_s22 + $0x1cc] ss:$12 sps:$4 sm:$0xff]   ;;  %v1965_v15 = vld [vmem:[%s2505_s22 + $0x1c8] ss:$12 sps:$4 sm:$0xff]   ;;  %v1966_v16 = vld [vmem:[%s2505_s22 + $0x64] ss:$12 sps:$4 sm:$0xff]  }
  0x79   : > { %1233 = vmatpush1.bf16.msra.mxu1 %v1952_v6  ;;  %v1968_v17 = vld [vmem:[%s2505_s22 + $0x1e4] ss:$12 sps:$4 sm:$0xff]   ;;  %v1970_v18 = vld [vmem:[%s2505_s22 + $0x60] ss:$12 sps:$4 sm:$0xff]   ;;  %v1972_v20 = vld [vmem:[%s2505_s22 + $0x7c] ss:$12 sps:$4 sm:$0xff]  }
  0x7a   : > { %1274 = vmatpush1.bf16.msra.mxu0 %v1953_v7  ;;  %1234 = vmatprep.subr.bf16.mxu1 %v1954_v8  ;;  %v1971_v19 = vld [vmem:[%s2505_s22 + $0x1e0] ss:$12 sps:$4 sm:$0xff]   ;;  %v1974_v21 = vld [vmem:[%s2505_s22 + $0x1fc] ss:$12 sps:$4 sm:$0xff]   ;;  %v1976_v22 = vld [vmem:[%s2505_s22 + $0x78] ss:$12 sps:$4 sm:$0xff]  }
  0x7b   : > { %1275 = vmatprep.subr.bf16.mxu0 %v1956_v9  ;;  %v1977_v23 = vld [vmem:[%s2505_s22 + $0x1f8] ss:$12 sps:$4 sm:$0xff]   ;;  %v1978_v24 = vld [vmem:[%s2505_s22 + $0x94] ss:$12 sps:$4 sm:$0xff]   ;;  %v1982_v26 = vld [vmem:[%s2505_s22 + $0x90] ss:$12 sps:$4 sm:$0xff]  }
  0x7c   : > { %v1980_v25 = vld [vmem:[%s2505_s22 + $0x214] ss:$12 sps:$4 sm:$0xff]   ;;  %v1983_v27 = vld [vmem:[%s2505_s22 + $0x210] ss:$12 sps:$4 sm:$0xff]   ;;  %v1984_v28 = vld [vmem:[%s2505_s22 + $0xac] ss:$12 sps:$4 sm:$0xff]  }
  0x7d   : > { %1235 = vmatpush1.bf16.msra.mxu1 %v1958_v10  ;;  %v1986_v29 = vld [vmem:[%s2505_s22 + $0x22c] ss:$12 sps:$4 sm:$0xff]   ;;  %v1988_v30 = vld [vmem:[%s2505_s22 + $0xa8] ss:$12 sps:$4 sm:$0xff]   ;;  %v1990_v32 = vld [vmem:[%s2505_s22 + $0xc4] ss:$12 sps:$4 sm:$0xff]  }
  0x7e   : > { %1276 = vmatpush1.bf16.msra.mxu0 %v1959_v11  ;;  %1236 = vmatprep.subr.bf16.mxu1 %v1960_v12  ;;  %v1989_v31 = vld [vmem:[%s2505_s22 + $0x228] ss:$12 sps:$4 sm:$0xff]   ;;  %v1992_v33 = vld [vmem:[%s2505_s22 + $0x244] ss:$12 sps:$4 sm:$0xff]   ;;  %v1994_v34 = vld [vmem:[%s2505_s22 + $0xc0] ss:$12 sps:$4 sm:$0xff]  }
  0x7f   : > { %1277 = vmatprep.subr.bf16.mxu0 %v1962_v13  ;;  %v1995_v35 = vld [vmem:[%s2505_s22 + $0x240] ss:$12 sps:$4 sm:$0xff]   ;;  %v1996_v36 = vld [vmem:[%s2505_s22 + $0xdc] ss:$12 sps:$4 sm:$0xff]   ;;  %v2000_v38 = vld [vmem:[%s2505_s22 + $0xd8] ss:$12 sps:$4 sm:$0xff]  }
  0x80   : > { %v1998_v37 = vld [vmem:[%s2505_s22 + $0x25c] ss:$12 sps:$4 sm:$0xff]   ;;  %v2001_v39 = vld [vmem:[%s2505_s22 + $0x258] ss:$12 sps:$4 sm:$0xff]   ;;  %v2002_v40 = vld [vmem:[%s2505_s22 + $0xf4] ss:$12 sps:$4 sm:$0xff]  }
  0x81   : > { %1237 = vmatpush1.bf16.msra.mxu1 %v1964_v14  ;;  %v2004_v41 = vld [vmem:[%s2505_s22 + $0x274] ss:$12 sps:$4 sm:$0xff]   ;;  %v2006_v42 = vld [vmem:[%s2505_s22 + $0xf0] ss:$12 sps:$4 sm:$0xff]   ;;  %v2008_v44 = vld [vmem:[%s2505_s22 + $0x10c] ss:$12 sps:$4 sm:$0xff]  }
  0x82   : > { %1278 = vmatpush1.bf16.msra.mxu0 %v1965_v15  ;;  %1238 = vmatprep.subr.bf16.mxu1 %v1966_v16  ;;  %v2007_v43 = vld [vmem:[%s2505_s22 + $0x270] ss:$12 sps:$4 sm:$0xff]   ;;  %v2010_v45 = vld [vmem:[%s2505_s22 + $0x28c] ss:$12 sps:$4 sm:$0xff]   ;;  %v2012_v47 = vld [vmem:[%s2505_s22 + $0x108] ss:$12 sps:$4 sm:$0xff]  }
  0x83   : > { %1279 = vmatprep.subr.bf16.mxu0 %v1968_v17  ;;  %v242_v46 = vld [vmem:[#allocation2 + $0x8] sm:$0xff]  ;;  %v244_v49 = vld [vmem:[#allocation2 + $0x18] sm:$0xff]  ;;  %v2014_v51 = vld [vmem:[%s2505_s22 + $0x124] ss:$12 sps:$4 sm:$0xff]   ;;  %s209_s4 = scalar_lea.vmem [#allocation7], %s1875_s30  ;;  %s1876_s5 = smul.u32 24, %s2502_s18 }
  0x84   : > { %v2558_v48 = vpack.c.bf16 %v242_v46, %v242_v46  ;;  %v2013_v50 = vld [vmem:[%s2505_s22 + $0x288] ss:$12 sps:$4 sm:$0xff]   ;;  %v2562_v52 = vpack.c.bf16 %v244_v49, %v244_v49  ;;  %v2016_v53 = vld [vmem:[%s2505_s22 + $0x2a4] ss:$12 sps:$4 sm:$0xff]   ;;  %v2018_v54 = vld [vmem:[%s2505_s22 + $0x120] ss:$12 sps:$4 sm:$0xff]  }
  0x85   : > { %1239 = vmatpush1.bf16.msra.mxu1 %v1970_v18  ;;  %v2019_v55 = vld [vmem:[%s2505_s22 + $0x2a0] ss:$12 sps:$4 sm:$0xff]   ;;  %v2020_v56 = vld [vmem:[%s2505_s22 + $0x13c] ss:$12 sps:$4 sm:$0xff]   ;;  %v2024_v58 = vld [vmem:[%s2505_s22 + $0x138] ss:$12 sps:$4 sm:$0xff]  }
  0x86   : > { %1280 = vmatpush1.bf16.msra.mxu0 %v1971_v19  ;;  %1240 = vmatprep.subr.bf16.mxu1 %v1972_v20  ;;  %v2022_v57 = vld [vmem:[%s2505_s22 + $0x2bc] ss:$12 sps:$4 sm:$0xff]   ;;  %v2025_v59 = vld [vmem:[%s2505_s22 + $0x2b8] ss:$12 sps:$4 sm:$0xff]   ;;  %v2026_v60 = vld [vmem:[%s2505_s22 + $0x154] ss:$12 sps:$4 sm:$0xff]  }
  0x87   : > { %1281 = vmatprep.subr.bf16.mxu0 %v1974_v21  ;;  %1262 = vmatprep.mubr.bf16.mxu1 %v2558_v48  ;;  %v2028_v61 = vld [vmem:[%s2505_s22 + $0x2d4] ss:$12 sps:$4 sm:$0xff]   ;;  %v2030_v62 = vld [vmem:[%s2505_s22 + $0x150] ss:$12 sps:$4 sm:$0xff]   ;;  %v2032_v0 = vld [vmem:[%s2505_s22 + $0x16c] ss:$12 sps:$4 sm:$0xff]  }
  0x88   : > { %1303 = vmatprep.mubr.bf16.mxu0 %v2562_v52  ;;  %v2031_v63 = vld [vmem:[%s2505_s22 + $0x2d0] ss:$12 sps:$4 sm:$0xff]   ;;  %v2034_v1 = vld [vmem:[%s2505_s22 + $0x2ec] ss:$12 sps:$4 sm:$0xff]   ;;  %v2036_v2 = vld [vmem:[%s2505_s22 + $0x168] ss:$12 sps:$4 sm:$0xff]  }
  0x89   : > { %1241 = vmatpush1.bf16.msra.mxu1 %v1976_v22  ;;  %v2037_v3 = vld [vmem:[%s2505_s22 + $0x2e8] ss:$12 sps:$4 sm:$0xff]   ;;  %v243_v5 = vld [vmem:[#allocation2 + $0x10] sm:$0xff]  ;;  %v2048_v18 = vld [vmem:[%s2505_s22 + $0x330] ss:$12 sps:$4 sm:$0xff]   ;;  %s236_s11 = scalar_lea.vmem [#allocation8], %s1876_s5 }
  0x8a   : > { %1282 = vmatpush1.bf16.msra.mxu0 %v1977_v23  ;;  %1242 = vmatprep.subr.bf16.mxu1 %v1978_v24  ;;  %v241_v4 = vld [vmem:[#allocation2] sm:$0xff]  ;;  %v2038_v8 = vld [vmem:[%s2505_s22 + $0x300] ss:$12 sps:$4 sm:$0xff]   ;;  %v2586_v10 = vpack.c.bf16 %v243_v5, %v243_v5  ;;  %v2045_v12 = vld [vmem:[%s2505_s22 + $0x31c] ss:$12 sps:$4 sm:$0xff]   ;;  %s1797_s20 = smul.u32 384, %s2405_s26 }
  0x8b   : > { %1283 = vmatprep.subr.bf16.mxu0 %v1980_v25  ;;  %v2040_v6 = vld [vmem:[%s2505_s22 + $0x304] ss:$12 sps:$4 sm:$0xff]   ;;  %v2041_v7 = vld [vmem:[%s2505_s22 + $0xc8] ss:$12 sps:$4 sm:$0xff]   ;;  %v2584_v9 = vpack.c.bf16 %v241_v4, %v241_v4  ;;  %v2046_v13 = vld [vmem:[%s2505_s22 + $0xe0] ss:$12 sps:$4 sm:$0xff]  }
  0x8c   : > { %v2042_v11 = vld [vmem:[%s2505_s22 + $0x8] ss:$12 sps:$4 sm:$0xff]   ;;  %v2043_v14 = vld [vmem:[%s2505_s22 + $0x318] ss:$12 sps:$4 sm:$0xff]   ;;  %v2047_v15 = vld [vmem:[%s2505_s22 + $0x20] ss:$12 sps:$4 sm:$0xff]   ;;  %s2681_s6 = scalar_lea.hbm %s2728_s3, %s1797_s20 }
  0x8d   : > { %1243 = vmatpush1.bf16.msra.mxu1 %v1982_v26  ;;  %v2050_v16 = vld [vmem:[%s2505_s22 + $0x334] ss:$12 sps:$4 sm:$0xff]   ;;  %v2051_v17 = vld [vmem:[%s2505_s22 + $0xf8] ss:$12 sps:$4 sm:$0xff]   ;;  %v2056_v21 = vld [vmem:[%s2505_s22 + $0x110] ss:$12 sps:$4 sm:$0xff]  }
  0x8e   : > { %1284 = vmatpush1.bf16.msra.mxu0 %v1983_v27  ;;  %1244 = vmatprep.subr.bf16.mxu1 %v1984_v28  ;;  %v2052_v19 = vld [vmem:[%s2505_s22 + $0x38] ss:$12 sps:$4 sm:$0xff]   ;;  %v2053_v22 = vld [vmem:[%s2505_s22 + $0x348] ss:$12 sps:$4 sm:$0xff]   ;;  %v2057_v23 = vld [vmem:[%s2505_s22 + $0x50] ss:$12 sps:$4 sm:$0xff]  }
  0x8f   : > { %1285 = vmatprep.subr.bf16.mxu0 %v1986_v29  ;;  %v2055_v20 = vld [vmem:[%s2505_s22 + $0x34c] ss:$12 sps:$4 sm:$0xff]   ;;  %v2060_v24 = vld [vmem:[%s2505_s22 + $0x364] ss:$12 sps:$4 sm:$0xff]   ;;  %v2061_v25 = vld [vmem:[%s2505_s22 + $0x128] ss:$12 sps:$4 sm:$0xff]  }
  0x90   : > { %v2058_v26 = vld [vmem:[%s2505_s22 + $0x360] ss:$12 sps:$4 sm:$0xff]   ;;  %v2062_v27 = vld [vmem:[%s2505_s22 + $0x68] ss:$12 sps:$4 sm:$0xff]   ;;  %v246_v46 = vld [vmem:[#allocation2 + $0x28] sm:$0xff]  ;;  %s1536_s25 = sshll.u32 %s236_s11, 4  ;;  %s2683_s25 = int_to_ptr.vmem [resolvable:$true] %s1536_s25 }
  0x91   : > { %1245 = vmatpush1.bf16.msra.mxu1 %v1988_v30  ;;  %v2065_v28 = vld [vmem:[%s2505_s22 + $0x37c] ss:$12 sps:$4 sm:$0xff]   ;;  %v2066_v29 = vld [vmem:[%s2505_s22 + $0x140] ss:$12 sps:$4 sm:$0xff]   ;;  %v2063_v30 = vld [vmem:[%s2505_s22 + $0x378] ss:$12 sps:$4 sm:$0xff]  }
  0x92   : > { %1286 = vmatpush1.bf16.msra.mxu0 %v1989_v31  ;;  %1246 = vmatprep.subr.bf16.mxu1 %v1990_v32  ;;  %v2067_v31 = vld [vmem:[%s2505_s22 + $0x80] ss:$12 sps:$4 sm:$0xff]   ;;  %v2108_v4 = vld [vmem:[%s2505_s22 + $0x450] ss:$12 sps:$4 sm:$0xff]   ;;  %v2112_v5 = vld [vmem:[%s2505_s22 + $0x218] ss:$12 sps:$4 sm:$0xff]  }
  0x93   : > { %1287 = vmatprep.subr.bf16.mxu0 %v1992_v33  ;;  %v2070_v32 = vld [vmem:[%s2505_s22 + $0x394] ss:$12 sps:$4 sm:$0xff]   ;;  %v2071_v33 = vld [vmem:[%s2505_s22 + $0x158] ss:$12 sps:$4 sm:$0xff]   ;;  %s1522_s7 = scalar_lea.sflag [#allocation4], %s2502_s18  ;;  %s2222_s8 = scalar_lea.vmem %s2683_s25, 384 }
  0x94   : > { %v2087_v49 = vld [vmem:[%s2505_s22 + $0x1a0] ss:$12 sps:$4 sm:$0xff]   ;;  %p2223_p12 = scmp.ne.s32.totalorder %s2683_s25, %s2222_s8  ;;  %p2749_p4 = scmp.ne.s32.totalorder %s2738_s27, 0 }
  0x95   : > { %1247 = vmatpush1.bf16.msra.mxu1 %v1994_v34  ;;  %v2068_v34 = vld [vmem:[%s2505_s22 + $0x390] ss:$12 sps:$4 sm:$0xff]   ;;  %s2300_s26 = smov [#allocation8]  }
  0x96   : > { %1288 = vmatpush1.bf16.msra.mxu0 %v1995_v35  ;;  %1248 = vmatprep.subr.bf16.mxu1 %v1996_v36  ;;  %v2072_v35 = vld [vmem:[%s2505_s22 + $0x98] ss:$12 sps:$4 sm:$0xff]   ;;  %p2224_p0 = pnand %p2223_p12, %p2749_p4  ;;  %s2226_s10 = sshll.u32 %s2300_s26, 4  ;;  %s2227_s10 = int_to_ptr.vmem [resolvable:$false] %s2226_s10 }
  0x97   : > { %1289 = vmatprep.subr.bf16.mxu0 %v1998_v37  ;;  %v2075_v36 = vld [vmem:[%s2505_s22 + $0x3ac] ss:$12 sps:$4 sm:$0xff]   ;;  %v2076_v37 = vld [vmem:[%s2505_s22 + $0x170] ss:$12 sps:$4 sm:$0xff]   ;;  %s2228_s24 = scalar_lea.vmem %s2227_s10, 768  ;;  %p2229_p13 = scmp.lt.s32.totalorder %s2683_s25, %s2227_s10 }
  0x98   : > { %p2225_p11 = pneg %p2224_p0  ;;  %p2230_p3 = scmp.lt.s32.totalorder %s2228_s24, %s2222_s8 }
  0x99   : > { %1249 = vmatpush1.bf16.msra.mxu1 %v2000_v38  ;;  %v2073_v38 = vld [vmem:[%s2505_s22 + $0x3a8] ss:$12 sps:$4 sm:$0xff]  }
  0x9a   : > { %1290 = vmatpush1.bf16.msra.mxu0 %v2001_v39  ;;  %1250 = vmatprep.subr.bf16.mxu1 %v2002_v40  ;;  %v2077_v39 = vld [vmem:[%s2505_s22 + $0xb0] ss:$12 sps:$4 sm:$0xff]   ;;  %p2231_p8 = por %p2230_p3, %p2229_p13 }
  0x9b   : > { %1291 = vmatprep.subr.bf16.mxu0 %v2004_v41  ;;  %v2080_v40 = vld [vmem:[%s2505_s22 + $0x3c4] ss:$12 sps:$4 sm:$0xff]   ;;  %v2081_v41 = vld [vmem:[%s2505_s22 + $0x248] ss:$12 sps:$4 sm:$0xff]  }
  0x9c   : > { %p2232_p1 = pnand %p2231_p8, %p2225_p11 }
  0x9d   : > { %1251 = vmatpush1.bf16.msra.mxu1 %v2006_v42  ;;  %v2078_v42 = vld [vmem:[%s2505_s22 + $0x3c0] ss:$12 sps:$4 sm:$0xff]  }
  0x9e   : > { %1292 = vmatpush1.bf16.msra.mxu0 %v2007_v43  ;;  %1252 = vmatprep.subr.bf16.mxu1 %v2008_v44  ;;  %v2082_v43 = vld [vmem:[%s2505_s22 + $0x188] ss:$12 sps:$4 sm:$0xff]  }
  0x9f   : > { %1293 = vmatprep.subr.bf16.mxu0 %v2010_v45  ;;  %v2085_v44 = vld [vmem:[%s2505_s22 + $0x3dc] ss:$12 sps:$4 sm:$0xff]   ;;  %v2086_v45 = vld [vmem:[%s2505_s22 + $0x260] ss:$12 sps:$4 sm:$0xff]  }
  0xa1   : > { %1253 = vmatpush1.bf16.msra.mxu1 %v2012_v47  ;;  %v2083_v47 = vld [vmem:[%s2505_s22 + $0x3d8] ss:$12 sps:$4 sm:$0xff]  }
  0xa2   : > { %1294 = vmatpush1.bf16.msra.mxu0 %v2013_v50  ;;  %1254 = vmatprep.subr.bf16.mxu1 %v2014_v51  ;;  %v2090_v50 = vld [vmem:[%s2505_s22 + $0x3f4] ss:$12 sps:$4 sm:$0xff]   ;;  %v2091_v51 = vld [vmem:[%s2505_s22 + $0x278] ss:$12 sps:$4 sm:$0xff]  }
  0xa3   : > { %1295 = vmatprep.subr.bf16.mxu0 %v2016_v53  ;;  %v2088_v53 = vld [vmem:[%s2505_s22 + $0x3f0] ss:$12 sps:$4 sm:$0xff]  }
  0xa5   : > { %1255 = vmatpush1.bf16.msra.mxu1 %v2018_v54  ;;  %v2092_v54 = vld [vmem:[%s2505_s22 + $0x1b8] ss:$12 sps:$4 sm:$0xff]  }
  0xa6   : > { %1296 = vmatpush1.bf16.msra.mxu0 %v2019_v55  ;;  %1256 = vmatprep.subr.bf16.mxu1 %v2020_v56  ;;  %v2095_v55 = vld [vmem:[%s2505_s22 + $0x40c] ss:$12 sps:$4 sm:$0xff]   ;;  %v2096_v56 = vld [vmem:[%s2505_s22 + $0x290] ss:$12 sps:$4 sm:$0xff]  }
  0xa7   : > { %1297 = vmatprep.subr.bf16.mxu0 %v2022_v57  ;;  %v2093_v57 = vld [vmem:[%s2505_s22 + $0x408] ss:$12 sps:$4 sm:$0xff]  }
  0xa9   : > { %1257 = vmatpush1.bf16.msra.mxu1 %v2024_v58  ;;  %v2097_v58 = vld [vmem:[%s2505_s22 + $0x1d0] ss:$12 sps:$4 sm:$0xff]  }
  0xaa   : > { %1298 = vmatpush1.bf16.msra.mxu0 %v2025_v59  ;;  %1258 = vmatprep.subr.bf16.mxu1 %v2026_v60  ;;  %v2100_v59 = vld [vmem:[%s2505_s22 + $0x424] ss:$12 sps:$4 sm:$0xff]   ;;  %v2098_v60 = vld [vmem:[%s2505_s22 + $0x420] ss:$12 sps:$4 sm:$0xff]  }
  0xab   : > { %1299 = vmatprep.subr.bf16.mxu0 %v2028_v61  ;;  %v2102_v61 = vld [vmem:[%s2505_s22 + $0x1e8] ss:$12 sps:$4 sm:$0xff]  }
  0xad   : > { %1259 = vmatpush1.bf16.msra.mxu1 %v2030_v62  ;;  %v2105_v62 = vld [vmem:[%s2505_s22 + $0x43c] ss:$12 sps:$4 sm:$0xff]  }
  0xae   : > { %1300 = vmatpush1.bf16.msra.mxu0 %v2031_v63  ;;  %1260 = vmatprep.subr.bf16.mxu1 %v2032_v0  ;;  %v2106_v63 = vld [vmem:[%s2505_s22 + $0x2c0] ss:$12 sps:$4 sm:$0xff]   ;;  %v2103_v0 = vld [vmem:[%s2505_s22 + $0x438] ss:$12 sps:$4 sm:$0xff]  }
  0xaf   : > { %1301 = vmatprep.subr.bf16.mxu0 %v2034_v1  ;;  %v2107_v1 = vld [vmem:[%s2505_s22 + $0x200] ss:$12 sps:$4 sm:$0xff]  }
  0xb1   : > { %1261 = vmatpush1.bf16.msra.mxu1 %v2036_v2  ;;  %v2110_v2 = vld [vmem:[%s2505_s22 + $0x454] ss:$12 sps:$4 sm:$0xff]  }
  0xb2   : > { %1302 = vmatpush1.bf16.msra.mxu0 %v2037_v3  ;;  %1798 = vmatprep.subr.bf16.mxu1 %v2041_v7  ;;  %v2111_v3 = vld [vmem:[%s2505_s22 + $0x2d8] ss:$12 sps:$4 sm:$0xff]   ;;  %v2116_v7 = vld [vmem:[%s2505_s22 + $0x2f0] ss:$12 sps:$4 sm:$0xff]  }
  0xb3   : > { %1312 = vmatprep.subr.bf16.mxu0 %v2040_v6  ;;  %v2115_v6 = vld [vmem:[%s2505_s22 + $0x46c] ss:$12 sps:$4 sm:$0xff]  }
  0xb4   : > { %1263 = vmatmul.mubr.bf16.vlgmr.msra.gmra.mrb[0].mxu1 %v2584_v9 }
  0xb5   : > { %1304 = vmatmul.mubr.bf16.vlgmr.msra.gmra.mrb[0].mxu0 %v2586_v10  ;;  %1799 = vmatpush3.bf16.msra.mxu1 %v2042_v11  ;;  %v245_v11 = vld [vmem:[#allocation2 + $0x20] sm:$0xff] }
  0xb6   : > { %1313 = vmatpush1.bf16.msra.mxu0 %v2038_v8  ;;  %1800 = vmatprep.subr.bf16.mxu1 %v2046_v13  ;;  %v2113_v8 = vld [vmem:[%s2505_s22 + $0x468] ss:$12 sps:$4 sm:$0xff]   ;;  %v251_v13 = vpack.c.bf16 %v245_v11, %v245_v11 }
  0xb7   : > { %1314 = vmatprep.subr.bf16.mxu0 %v2045_v12  ;;  %1385 = vmatprep.mubr.bf16.mxu1 %v2558_v48  ;;  %v2627_v48 = vpack.c.bf16 %v246_v46, %v246_v46  ;;  %v2118_v12 = vld [vmem:[%s2505_s22 + $0x3c8] ss:$12 sps:$4 sm:$0xff]  }
  0xb8   : > { %v1790_v46 = vld [vmem:[%s209_s4 + $0x1] ss:$4 sm:$0x7] }
  0xb9   : > { %1801 = vmatpush3.bf16.msra.mxu1 %v2047_v15  ;;  %1344 = vmatprep.mubr.bf16.mxu0 %v2627_v48  ;;  %v2120_v15 = vld [vmem:[%s2505_s22 + $0x3e0] ss:$12 sps:$4 sm:$0xff]  }
  0xba   : > { %1315 = vmatpush1.bf16.msra.mxu0 %v2043_v14  ;;  %1802 = vmatprep.subr.bf16.mxu1 %v2051_v17  ;;  %v2119_v14 = vld [vmem:[%s2505_s22 + $0x308] ss:$12 sps:$4 sm:$0xff]   ;;  %v2122_v17 = vld [vmem:[%s2505_s22 + $0x3f8] ss:$12 sps:$4 sm:$0xff]  }
  0xbb   : > { %1316 = vmatprep.subr.bf16.mxu0 %v2050_v16  ;;  %v2121_v16 = vld [vmem:[%s2505_s22 + $0x320] ss:$12 sps:$4 sm:$0xff]  }
  0xbd   : > { %1803 = vmatpush3.bf16.msra.mxu1 %v2052_v19  ;;  %v2124_v19 = vld [vmem:[%s2505_s22 + $0x410] ss:$12 sps:$4 sm:$0xff]  }
  0xbe   : > { %1317 = vmatpush1.bf16.msra.mxu0 %v2048_v18  ;;  %1804 = vmatprep.subr.bf16.mxu1 %v2056_v21  ;;  %v2123_v18 = vld [vmem:[%s2505_s22 + $0x338] ss:$12 sps:$4 sm:$0xff]   ;;  %v2127_v21 = vld [vmem:[%s2505_s22 + $0x368] ss:$12 sps:$4 sm:$0xff]  }
  0xbf   : > { %1318 = vmatprep.subr.bf16.mxu0 %v2055_v20  ;;  %v2125_v20 = vld [vmem:[%s2505_s22 + $0x350] ss:$12 sps:$4 sm:$0xff]  }
  0xc1   : > { %1805 = vmatpush3.bf16.msra.mxu1 %v2057_v23  ;;  %v2129_v23 = vld [vmem:[%s2505_s22 + $0x380] ss:$12 sps:$4 sm:$0xff]  }
  0xc2   : > { %1319 = vmatpush1.bf16.msra.mxu0 %v2053_v22  ;;  %1806 = vmatprep.subr.bf16.mxu1 %v2061_v25  ;;  %v2128_v22 = vld [vmem:[%s2505_s22 + $0x440] ss:$12 sps:$4 sm:$0xff]   ;;  %v2131_v25 = vld [vmem:[%s2505_s22 + $0x398] ss:$12 sps:$4 sm:$0xff]  }
  0xc3   : > { %1320 = vmatprep.subr.bf16.mxu0 %v2060_v24  ;;  %v2130_v24 = vld [vmem:[%s2505_s22 + $0x458] ss:$12 sps:$4 sm:$0xff]  }
  0xc5   : > { %1807 = vmatpush3.bf16.msra.mxu1 %v2062_v27  ;;  %v2133_v27 = vld [vmem:[%s2505_s22 + $0x3b0] ss:$12 sps:$4 sm:$0xff]  }
  0xc6   : > { %1321 = vmatpush1.bf16.msra.mxu0 %v2058_v26  ;;  %1808 = vmatprep.subr.bf16.mxu1 %v2066_v29  ;;  %v2132_v26 = vld [vmem:[%s2505_s22 + $0x470] ss:$12 sps:$4 sm:$0xff]  }
  0xc7   : > { %1322 = vmatprep.subr.bf16.mxu0 %v2065_v28 }
  0xc9   : > { %1809 = vmatpush3.bf16.msra.mxu1 %v2067_v31 }
  0xca   : > { %1323 = vmatpush1.bf16.msra.mxu0 %v2063_v30  ;;  %1810 = vmatprep.subr.bf16.mxu1 %v2071_v33 }
  0xcb   : > { %1324 = vmatprep.subr.bf16.mxu0 %v2070_v32 }
  0xcd   : > { %1811 = vmatpush3.bf16.msra.mxu1 %v2072_v35 }
  0xce   : > { %1325 = vmatpush1.bf16.msra.mxu0 %v2068_v34  ;;  %1812 = vmatprep.subr.bf16.mxu1 %v2076_v37  ;;  %v447_v37 = vlaneseq }
  0xcf   : > { %1326 = vmatprep.subr.bf16.mxu0 %v2075_v36 }
  0xd1   : > { %1813 = vmatpush3.bf16.msra.mxu1 %v2077_v39 }
  0xd2   : > { %1327 = vmatpush1.bf16.msra.mxu0 %v2073_v38  ;;  %1820 = vmatprep.subr.bf16.mxu1 %v2081_v41  ;;  %v448_v38 = vshrl.u32 %v447_v37, 7 }
  0xd3   : > { %1328 = vmatprep.subr.bf16.mxu0 %v2080_v40  ;;  %v445_v40 = vld [vmem:[%s209_s4] ss:$4 sm:$0x7] }
  0xd4   : > { %1386 = vmatmul.mubr.bf16.vlgmr.msra.gmra.mrb[4].mxu1 %v2584_v9  ;;  %v2117_v9 = vld [vmem:[%s2505_s22 + $0x230] ss:$12 sps:$4 sm:$0xff]   ;;  %v449_v39 = vsub.s32 0, %v448_v38  ;;  %v453_v41 = vsub.s32 1, %v448_v38 }
  0xd5   : > { %1821 = vmatpush3.bf16.msra.mxu1 %v2082_v43  ;;  %1425 = vmatprep.mubr.bf16.mxu1 %v2562_v52  ;;  %v2101_v52 = vld [vmem:[%s2505_s22 + $0x2a8] ss:$12 sps:$4 sm:$0xff]  }
  0xd6   : > { %1329 = vmatpush1.bf16.msra.mxu0 %v2078_v42  ;;  %1822 = vmatprep.subr.bf16.mxu1 %v2086_v45  ;;  %v457_v42 = vsub.s32 2, %v448_v38  ;;  %v450_v43 = vrot.slane %v445_v40, %v449_v39 }
  0xd7   : > { %1330 = vmatprep.subr.bf16.mxu0 %v2085_v44  ;;  %v454_v44 = vrot.slane %v445_v40, %v453_v41 }
  0xd8   : > { %v458_v45 = vrot.slane %v445_v40, %v457_v42 }
  0xd9   : > { %1823 = vmatpush3.bf16.msra.mxu1 %v2087_v49 }
  0xda   : > { %1331 = vmatpush1.bf16.msra.mxu0 %v2083_v47  ;;  %1824 = vmatprep.subr.bf16.mxu1 %v2091_v51 }
  0xdb   : > { %1332 = vmatprep.subr.bf16.mxu0 %v2090_v50  ;;  %v1791_v50 = vld [vmem:[%s209_s4 + $0x2] ss:$4 sm:$0x7] }
  0xdd   : > { %1825 = vmatpush3.bf16.msra.mxu1 %v2092_v54  ;;  %v1482_v54 = vrot.slane %v1790_v46, %v449_v39 }
  0xde   : > { %1333 = vmatpush1.bf16.msra.mxu0 %v2088_v53  ;;  %1826 = vmatprep.subr.bf16.mxu1 %v2096_v56 }
  0xdf   : > { %1334 = vmatprep.subr.bf16.mxu0 %v2095_v55 }
  0xe1   : > { %1827 = vmatpush3.bf16.msra.mxu1 %v2097_v58 }
  0xe2   : > { %1335 = vmatpush1.bf16.msra.mxu0 %v2093_v57  ;;  %1828 = vmatprep.subr.bf16.mxu1 %v2101_v52 }
  0xe3   : > { %1336 = vmatprep.subr.bf16.mxu0 %v2100_v59  ;;  %v1486_v59 = vrot.slane %v1790_v46, %v453_v41 }
  0xe5   : > { %1829 = vmatpush3.bf16.msra.mxu1 %v2102_v61 }
  0xe6   : > { %1337 = vmatpush1.bf16.msra.mxu0 %v2098_v60  ;;  %1830 = vmatprep.subr.bf16.mxu1 %v2106_v63  ;;  %v1503_v63 = vrot.slane %v1791_v50, %v449_v39 }
  0xe7   : > { %1338 = vmatprep.subr.bf16.mxu0 %v2105_v62 }
  0xe9   : > { %1831 = vmatpush3.bf16.msra.mxu1 %v2107_v1 }
  0xea   : > { %1339 = vmatpush1.bf16.msra.mxu0 %v2103_v0  ;;  %1832 = vmatprep.subr.bf16.mxu1 %v2111_v3  ;;  %v1507_v3 = vrot.slane %v1791_v50, %v453_v41 }
  0xeb   : > { %1340 = vmatprep.subr.bf16.mxu0 %v2110_v2 }
  0xed   : > { %1833 = vmatpush3.bf16.msra.mxu1 %v2112_v5 }
  0xee   : > { %1341 = vmatpush1.bf16.msra.mxu0 %v2108_v4  ;;  %1834 = vmatprep.subr.bf16.mxu1 %v2116_v7 }
  0xef   : > { %1342 = vmatprep.subr.bf16.mxu0 %v2115_v6 }
  0xf1   : > { %1835 = vmatpush3.bf16.msra.mxu1 %v2117_v9 }
  0xf2   : > { %1343 = vmatpush1.bf16.msra.mxu0 %v2113_v8  ;;  %1842 = vmatprep.subr.bf16.mxu1 %v2118_v12 }
  0xf4   : > { %1426 = vmatmul.mubr.bf16.vlgmr.msra.gmra.mrb[8].mxu1 %v2586_v10  ;;  %v2126_v10 = vld [vmem:[%s2505_s22 + $0x428] ss:$12 sps:$4 sm:$0xff]  }
  0xf5   : > { %1345 = vmatmul.mubr.bf16.vlgmr.msra.gmra.mrb[0].mxu0 %v251_v13  ;;  %1843 = vmatpush3.bf16.msra.mxu1 %v2119_v14 }
  0xf6   : > { %1465 = vmatprep.mubr.bf16.mxu1 %v2627_v48  ;;  %1844 = vmatprep.subr.bf16.mxu1 %v2120_v15 }
  0xf9   : > { %1845 = vmatpush3.bf16.msra.mxu1 %v2121_v16  ;;  %v1490_v16 = vrot.slane %v1790_v46, %v457_v42 }
  0xfa   : > { %1846 = vmatprep.subr.bf16.mxu1 %v2122_v17 }
  0xfd   : > { %1847 = vmatpush3.bf16.msra.mxu1 %v2123_v18  ;;  %v1511_v18 = vrot.slane %v1791_v50, %v457_v42 }
  0xfe   : > { %1848 = vmatprep.subr.bf16.mxu1 %v2124_v19 }
 0x101   : > { %1849 = vmatpush3.bf16.msra.mxu1 %v2125_v20 }
 0x102   : > { %1850 = vmatprep.subr.bf16.mxu1 %v2126_v10 }
 0x105   : > { %1851 = vmatpush3.bf16.msra.mxu1 %v2127_v21 }
 0x106   : > { %1852 = vmatprep.subr.bf16.mxu1 %v2128_v22 }
 0x109   : > { %1853 = vmatpush3.bf16.msra.mxu1 %v2129_v23 }
 0x10a   : > { %1854 = vmatprep.subr.bf16.mxu1 %v2130_v24 }
 0x10d   : > { %1855 = vmatpush3.bf16.msra.mxu1 %v2131_v25 }
 0x10e   : > { %1856 = vmatprep.subr.bf16.mxu1 %v2132_v26 }
 0x111   : > { %1857 = vmatpush3.bf16.msra.mxu1 %v2133_v27 }
 0x114   : > { %1466 = vmatmul.mubr.bf16.vlgmr.msra.gmra.mrb[12].mxu1 %v251_v13 }
 0x187   : > { %v1264_v28 = vpop.f32.mrb[0].mxu1 }
 0x188   : > { %v1266_v29 = vpop.f32.mrb[1].mxu1  ;;  %v1265_v47 = vadd.f32 %v1264_v28, %v450_v43 }
 0x189   : > { %v1268_v30 = vpop.f32.mrb[2].mxu1  ;;  %v1267_v48 = vadd.f32 %v1266_v29, %v454_v44 }
 0x18a   : > { %v1269_v31 = vpop.f32.mrb[3].mxu1 }
 0x1a7   : > { %v1814_v32 = vpop.f32.mrb[4].mxu1 }
 0x1a8   : > { %v1815_v33 = vpop.f32.mrb[5].mxu1 }
 0x1a9   : > { %v1816_v34 = vadd.f32 %v1815_v33, %v1814_v32  ;;  %v1817_v35 = vpop.f32.mrb[6].mxu1 }
 0x1aa   : > { %v1818_v36 = vpop.f32.mrb[7].mxu1 }
 0x1ab   : > { %v1388_v57 = vadd.f32 %v1816_v34, %v458_v45 }
 0x1c7   : > { %v1836_v51 = vpop.f32.mrb[8].mxu1 }
 0x1c8   : > { %v1346_v49 = vpop.f32.mrb[0].mxu0  ;;  %v1837_v56 = vpop.f32.mrb[9].mxu1 }
 0x1c9   : > { %v1865_v53 = vadd.f32 %v1346_v49, %v1265_v47  ;;  %v1348_v55 = vpop.f32.mrb[1].mxu0  ;;  %v1838_v52 = vadd.f32 %v1837_v56, %v1836_v51  ;;  %v1839_v61 = vpop.f32.mrb[10].mxu1 }
 0x1ca   : > { %v1867_v58 = vadd.f32 %v1348_v55, %v1267_v48  ;;  %v1350_v60 = vpop.f32.mrb[2].mxu0  ;;  %v1840_v1 = vpop.f32.mrb[11].mxu1 }
 0x1cb   : > { %v1473_v62 = vmax.f32 %v1865_v53, 0.0  ;;  %v1351_v0 = vpop.f32.mrb[3].mxu0  ;;  %v1428_v4 = vadd.f32 %v1838_v52, %v1388_v57 }
 0x1cc   : > { %v1474_v2 = vmax.f32 %v1867_v58, 0.0 }
 0x1cd   : > { %v1494_v5 = vmul.f32 %v1482_v54, %v1473_v62 }
 0x1ce   : > { %v1495_v6 = vmul.f32 %v1486_v59, %v1474_v2 }
 0x1cf   : > { %v1515_v7 = vadd.f32 %v1503_v63, %v1494_v5 }
 0x1d0   : > { %v1516_v8 = vadd.f32 %v1507_v3, %v1495_v6 }
 0x1d1   : > { %1518 = vst [vmem:[%s236_s11] sm:$0xff] %v1515_v7 }
 0x1d2   : > { %1519 = vst [vmem:[%s236_s11 + $0x8] sm:$0xff] %v1516_v8 }
 0x1e7   : > { %v1858_v9 = vpop.f32.mrb[12].mxu1 }
 0x1e8   : > { %v1859_v11 = vpop.f32.mrb[13].mxu1 }
 0x1e9   : > { %v1860_v12 = vadd.f32 %v1859_v11, %v1858_v9  ;;  %v1861_v13 = vpop.f32.mrb[14].mxu1 }
 0x1ea   : > { %v1862_v14 = vpop.f32.mrb[15].mxu1 }
 0x1eb   : > { %v1468_v15 = vadd.f32 %v1860_v12, %v1428_v4 }
 0x1ed   : > { %v1475_v17 = vmax.f32 %v1468_v15, 0.0 }
 0x1ef   : > { %v1496_v19 = vmul.f32 %v1490_v16, %v1475_v17 }
 0x1f1   : > { %v1517_v20 = vadd.f32 %v1511_v18, %v1496_v19 }
 0x1f3   : > { %1520 = vst [vmem:[%s236_s11 + $0x10] sm:$0xff] %v1517_v20 }
 0x1f4   : > { %2235 = shalt.err (!%p2232_p1)
}
 0x1f5   : > { %s2236_s17 = scalar_lea.hbm %s2681_s6, 384  ;;  %s2240_s21 = scalar_lea.hbm %s2728_s3, 768 }
 0x1f6   : > { %p2237_p6 = scmp.ne.s32.totalorder %s2681_s6, %s2236_s17  ;;  %p2241_p7 = scmp.lt.u32.totalorder %s2681_s6, %s2728_s3 }
 0x1f7   : > { %p2242_p9 = scmp.lt.u32.totalorder %s2240_s21, %s2236_s17  ;;  %p2244_p12 = scmp.lt.u32.totalorder %s2236_s17, %s2681_s6 }
 0x1f8   : > { %p2238_p5 = pnand %p2237_p6, %p2749_p4 }
 0x1f9   : > { %p2243_p10 = por %p2242_p9, %p2241_p7 }
 0x1fa   : > { %p2239_p2 = pneg %p2238_p5 }
 0x1fb   : > { %p2245_p0 = por %p2244_p12, %p2243_p10 }
 0x1fd   : > { %p2246_p11 = pnand %p2245_p0, %p2239_p2 }
 0x1ff   : > { %2249 = shalt.err (!%p2246_p11)
}
 0x200   : > { %1885 = dma.vmem_to_hbm [thread:$0]  (%p2749_p4), %s2683_s25, 384, %s2681_s6, %s1522_s7  }
 0x201 PF: > { %s1548_s4 = sand.u32 1, %s2280_s12   ;;  %p2750_p13 = scmp.ne.s32.totalorder %s2739_s29, 0 }
 0x202   : > { %p2751_p3 = scmp.ge.s32.totalorder %s2292_s15, 2  ;;  %s1549_s5 = scalar_lea.sflag [#allocation4], %s1548_s4 }
 0x204   : > { %p1899_p8 = pnand %p2751_p3, %p2750_p13 }
 0x206   : > { %2275 = dma.done.wait (!%p1899_p8), %s1549_s5, 384  }
 0x207   : > { %2277 = vsyncadd (!%p1899_p8), %s1549_s5, 4294966912  ;;  %p17_p1 = scmp.ge.s32.totalorder %s2342_s16, 4   ;;  %s2752_s12 = smov %s2284_s13 }
 0x208   : > { %s2753_s13 = smov %s2288_s14  ;;  %s2754_s14 = smov %s2353_s19 }
 0x209   : > { %s2755_s15 = smov %s2342_s16  ;;  %19 = sbr.rel (!%p17_p1) target bundleno = 6 (0x6), region = 95 }
 0x210   :  { %1554 = vsyncpa [#allocation3], 1 }
 0x211   :  { %1556 = vsyncpa [#allocation3 + $0x1], 1 }
 0x212   :  { %1557 = vsyncpa [#allocation6], 1 }
 0x213   :  { %1559 = vsyncpa [#allocation6 + $0x1], 1 }
 0x214   :  { %1560 = vsyncpa [#allocation4], 1 }
 0x215   :  { %1562 = vsyncpa [#allocation4 + $0x1], 1 }

</bundles_post_ra>
